<compile_context>
chip_gen: v5e
topology: v5e:2x2
jax: 0.10.0
libtpu: 0.0.40
codegen_flags: <defaults>
</compile_context>

<pallas_src>
import math

import jax
import jax.numpy as jnp
from jax.experimental import pallas as pl
from jax.experimental.pallas import tpu as pltpu


def _pos_enc_kernel(x_ref, pe_ref, o_ref):
    # x_ref: [1, ts, Ek]   pe_ref: [ts, Ek]   o_ref: [1, ts, Ek]
    # Compute in the (promoted) output dtype, matching torch's `x + pe`.
    o_ref[...] = x_ref[...].astype(o_ref.dtype) + pe_ref[...].astype(o_ref.dtype)


def make_positional_encoding(embed_dim, max_len=5000, dtype=jnp.float32):
    """Builds the sinusoidal pe buffer exactly as the PyTorch __init__ does.

    Returns [max_len, embed_dim] in `dtype` (built once; no per-call work).
    """
    assert embed_dim % 2 == 0, "PositionalEncoding requires an even embed_dim"
    position = jnp.arange(max_len, dtype=jnp.float32)[:, None]            # [L, 1]
    div_term = jnp.exp(
        jnp.arange(0, embed_dim, 2, dtype=jnp.float32)
        * (-math.log(10000.0) / embed_dim))                               # [E/2]
    angles = position * div_term                                          # [L, E/2]
    pe = jnp.zeros((max_len, embed_dim), jnp.float32)
    pe = pe.at[:, 0::2].set(jnp.sin(angles))
    pe = pe.at[:, 1::2].set(jnp.cos(angles))
    return pe.astype(dtype)


def positional_encoding(x, pe, *, target_tile_bytes=2 << 20, donate_x=False):
    """x: [B, S, E]; pe: [max_len, E] with max_len >= S. Returns [B, S, E]."""
    B, S, E = x.shape
    max_len, E_pe = pe.shape
    assert E_pe == E and max_len >= S, "pe buffer too small for input"

    out_dtype = jnp.promote_types(x.dtype, pe.dtype)

    # ---- lane-dense folding: fold r seq rows into the lane axis when E < 128.
    # The elementwise add is layout-invariant under this coupled reshape
    # (x[b, s*r + j//E, j%E] pairs with pe[s*r + j//E, j%E]); reshapes are
    # contiguous so XLA treats them as metadata-only.
    r = 1
    if E % 128 != 0:
        r_cand = 128 // math.gcd(E, 128)
        if r_cand > 1 and S % r_cand == 0 and max_len % r_cand == 0:
            r = r_cand
    if r > 1:
        x_k = x.reshape(B, S // r, r * E)
        pe_k = pe.reshape(max_len // r, r * E)
    else:
        x_k, pe_k = x, pe
    S_k, E_k = x_k.shape[1], x_k.shape[2]

    x_isz = jnp.dtype(x.dtype).itemsize
    pe_isz = jnp.dtype(pe.dtype).itemsize
    o_isz = jnp.dtype(out_dtype).itemsize

    # ---- seq tile from a byte budget, sublane-aligned, masked tail for ragged S.
    sub = max(8, 32 // o_isz)          # sublane multiple: 8 f32, 16 bf16, 32 int8
    pe_arr = pe_k
    if S_k >= sub:
        ts = max(sub, min(target_tile_bytes // (E_k * o_isz), 2048, S_k))
        ts = (ts // sub) * sub         # multiple of 8 -> legal block, masked tail ok
    else:
        # Tiny ragged sequence: single full-extent block; slice pe so its block
        # is also full-extent (keeps the (8,128) block-shape rule satisfied).
        ts = S_k
        pe_arr = pe_k[:S_k]
    grid_s = pl.cdiv(S_k, ts)
    grid = (grid_s, B)                 # batch innermost: pe tile reused across batch

    tile_elems = ts * E_k
    vmem_bytes = 2 * tile_elems * (x_isz + pe_isz + o_isz) + (2 << 20)
    vmem_bytes = int(min(max(vmem_bytes, 4 << 20), 48 << 20))

    cost = pl.CostEstimate(
        flops=B * S * E,
        transcendentals=0,
        bytes_accessed=B * S * E * (x_isz + o_isz) + S * E * pe_isz,
    )

    # Optional in-place update when the caller donates x (dtypes must match).
    aliases = {0: 0} if (donate_x and x.dtype == out_dtype) else {}

    out = pl.pallas_call(
        _pos_enc_kernel,
        out_shape=jax.ShapeDtypeStruct((B, S_k, E_k), out_dtype),
        grid_spec=pltpu.PrefetchScalarGridSpec(
            num_scalar_prefetch=0,
            grid=grid,
            in_specs=[
                pl.BlockSpec((1, ts, E_k), lambda s, b: (b, s, 0)),   # x tile
                pl.BlockSpec((ts, E_k), lambda s, b: (s, 0)),         # pe rows (batch-invariant)
            ],
            out_specs=pl.BlockSpec((1, ts, E_k), lambda s, b: (b, s, 0)),
        ),
        compiler_params=pltpu.CompilerParams(
            dimension_semantics=("parallel", "parallel"),
            vmem_limit_bytes=vmem_bytes,
        ),
        cost_estimate=cost,
        input_output_aliases=aliases,
    )(x_k, pe_arr)

    return out.reshape(B, S, E) if r > 1 else out


def reference(x, pe):
    """Pure-JAX reference mirroring the PyTorch forward (with promotion)."""
    return x + pe[None, : x.shape[1], :]


if __name__ == "__main__":
    B, S, E = 2, 64, 32              # batch, seq, embed_dim (toy shapes)
    key = jax.random.PRNGKey(0)
    x = jax.random.normal(key, (B, S, E), jnp.float32)

    pe = make_positional_encoding(E, max_len=5000)

    out = jax.block_until_ready(positional_encoding(x, pe))

    ref = reference(x, pe)
    assert out.shape == (B, S, E) and out.dtype == ref.dtype
    err = float(jnp.max(jnp.abs(out - ref)))
    assert err <= 1e-6, f"max err {err}"

    print("KERNEL_OK")
</pallas_src>

<mosaic_0001>
module attributes {stable_mosaic.version = 11 : i64} {
  func.func @_pos_enc_kernel(%arg0: i32, %arg1: i32, %arg2: memref<1x16x128xf32, #tpu.memory_space<vmem>>, %arg3: memref<16x128xf32, #tpu.memory_space<vmem>>, %arg4: memref<1x16x128xf32, #tpu.memory_space<vmem>>) attributes {dimension_semantics = [#tpu.dimension_semantics<parallel>, #tpu.dimension_semantics<parallel>], iteration_bounds = array<i64: 1, 2>, scalar_prefetch = 0 : i64, scratch_operands = 0 : i64, tpu.core_type = #tpu.core_type<tc>, window_params = [{transform_indices = @transform_0, window_bounds = array<i64: 1, 16, 128>}, {transform_indices = @transform_1, window_bounds = array<i64: 16, 128>}, {transform_indices = @transform_2, window_bounds = array<i64: 1, 16, 128>}]} {
    %c0 = arith.constant 0 : index
    %c0_0 = arith.constant 0 : index
    %c0_1 = arith.constant 0 : index
    %0 = vector.load %arg2[%c0, %c0_0, %c0_1] : memref<1x16x128xf32, #tpu.memory_space<vmem>>, vector<1x16x128xf32>
    %c0_2 = arith.constant 0 : index
    %c0_3 = arith.constant 0 : index
    %1 = vector.load %arg3[%c0_2, %c0_3] : memref<16x128xf32, #tpu.memory_space<vmem>>, vector<16x128xf32>
    %2 = vector.shape_cast %1 : vector<16x128xf32> to vector<1x16x128xf32>
    %3 = arith.addf %0, %2 : vector<1x16x128xf32>
    %c0_4 = arith.constant 0 : index
    %c0_5 = arith.constant 0 : index
    %c0_6 = arith.constant 0 : index
    %4 = vector.load %arg4[%c0_4, %c0_5, %c0_6] : memref<1x16x128xf32, #tpu.memory_space<vmem>>, vector<1x16x128xf32>
    tpu.vector_store %arg4[%c0_4, %c0_5, %c0_6], %3 {strides = array<i32>} : memref<1x16x128xf32, #tpu.memory_space<vmem>>, vector<1x16x128xf32>,
    return
  }
  func.func @transform_0(%arg0: i32, %arg1: i32) -> (i32, i32, i32) {
    %c0_i32 = arith.constant 0 : i32
    %c0_i32_0 = arith.constant 0 : i32
    return %arg1, %arg0, %c0_i32 : i32, i32, i32
  }
  func.func @transform_1(%arg0: i32, %arg1: i32) -> (i32, i32) {
    %c0_i32 = arith.constant 0 : i32
    %c0_i32_0 = arith.constant 0 : i32
    return %arg0, %c0_i32 : i32, i32
  }
  func.func @transform_2(%arg0: i32, %arg1: i32) -> (i32, i32, i32) {
    %c0_i32 = arith.constant 0 : i32
    %c0_i32_0 = arith.constant 0 : i32
    return %arg1, %arg0, %c0_i32 : i32, i32, i32
  }
}

</mosaic_0001>

<bundles_post_ra>
// kernel: tpu_custom_call.1
= control target key start
LH: loop header
LB: loop body
LE: loop exit
PB: predicated region body
PF: predicated region fallthrough
CT: control target
= control target key end

     0   :  { %7 = vsyncpa [#allocation3], 0  ;;  %s765_s0 = inlined_call_operand.hbm [shape: f32[2,16,128], index: 0, kind: input, shape index: {}]   ;;  %s766_s1 = inlined_call_operand.hbm [shape: f32[1250,128], index: 1, kind: input, shape index: {}]   ;;  %s767_s2 = inlined_call_operand.hbm [shape: f32[2,16,128], index: 2, kind: output, shape index: {}]  }
   0x1   :  { %9 = vsyncpa [#allocation3 + $0x1], 0 }
   0x2   :  { %10 = vsyncpa [#allocation6], 0 }
   0x3   :  { %11 = vsyncpa [#allocation4], 0 }
   0x4   :  { %13 = vsyncpa [#allocation4 + $0x1], 0  ;;  %s610_s9 = smov 0   ;;  %s612_s10 = smov 0  }
   0x5   :  { %s614_s11 = smov 0   ;;  %s616_s12 = smov 0  }
   0x6   :  { %s618_s13 = smov 0   ;;  %s620_s14 = smov 0  }
   0x7 LB: > { %s346_s15 = sadd.s32 4294967295, %s588_s14   ;;  %s347_s16 = sadd.s32 4294967294, %s588_s14   ;;  %s588_s14 = sphi %s620_s14, %s19_s14   ;;  %s584_s13 = sphi %s618_s13, %s779_s13   ;;  %s580_s12 = sphi %s616_s12, %s778_s12   ;;  %s576_s11 = sphi %s614_s11, %s777_s11   ;;  %s572_s10 = sphi %s612_s10, %s776_s10   ;;  %s568_s9 = sphi %s610_s9, %s775_s9  }
   0x8   : > { %p53_p0 = scmp.ne.s32.totalorder %s572_s10, %s568_s9  ;;  %p644_p1 = scmp.eq.s32.totalorder %s346_s15, 0 }
   0x9   : > { %p648_p2 = scmp.eq.s32.totalorder %s346_s15, 1  ;;  %p111_p3 = scmp.eq.s32.totalorder %s347_s16, 1 }
   0xa   : > { %p654_p4 = por %p644_p1, %p53_p0  ;;  %p348_p5 = scmp.ge.s32.totalorder %s588_s14, 1 }
   0xb   : > { %p659_p6 = por %p111_p3, %p53_p0  ;;  %p118_p7 = scmp.lt.s32.totalorder %s588_s14, 3 }
   0xc   : > { %s139_s23 = sshll.u32 %s766_s1, 4  ;;  %s590_s25 = smov [#allocation5]   ;;  %s140_s23 = int_to_ptr.hbm [resolvable:$true] %s139_s23 }
   0xd   : > { %p667_p8 = pnand %p348_p5, %p118_p7  ;;  %s141_s26 = sshll.u32 %s590_s25, 4  ;;  %s142_s26 = int_to_ptr.vmem [resolvable:$true] %s141_s26 }
   0xe   : > { %p350_p11 = scmp.ge.s32.totalorder %s588_s14, 2  ;;  %s591_s27 = smov 128  }
   0xf   : > { %p373_p9 = pneg %p667_p8  ;;  %s592_s28 = smov 8  }
  0x10   : > { %s28_s29 = sadd.s32 1, %s584_s13  ;;  %s40_s30 = sadd.s32 1, %s576_s11 }
  0x11   : > { %p374_p10 = pnand %p373_p9, %p644_p1  ;;  %p29_p12 = scmp.ge.s32.totalorder %s28_s29, 2 }
  0x12   : > { %p47_p13 = scmp.ne.s32.totalorder %s576_s11, %s572_s10  ;;  %p48_p0 = scmp.eq.s32.totalorder %s588_s14, 0 }
  0x13   : > { %376 = dma.hbm_to_vmem [thread:$0]  (!%p374_p10), %s140_s23, 256, %s142_s26, [#allocation6], %s591_s27, %s591_s27, %s592_s28  }
  0x14   : > { %s781_s29 = smov (%p29_p12, %s28_s29), 0  ;;  %p686_p3 = por %p48_p0, %p47_p13 }
  0x15   : > { %p692_p5 = por %p648_p2, %p47_p13  ;;  %s35_s5 = ssub.s32 %s584_s13, %s781_s29 }
  0x16   : > { %p386_p7 = scmp.lt.s32.totalorder %s588_s14, 2  ;;  %p38_p9 = scmp.eq.s32.totalorder %s35_s5, 0 }
  0x17   : > { %s155_s6 = sand.u32 1, %s576_s11   ;;  %s363_s15 = sshll.u32 %s584_s13, 4 }
  0x18   : > { %s351_s7 = sshll.u32 %s155_s6, 4  ;;  %s166_s22 = scalar_lea.hbm %s765_s0, %s363_s15 }
  0x19   : > { %s701_s8 = scalar_select %p38_p9, %s576_s11, %s40_s30  }
  0x1a   : > { %s159_s23 = scalar_lea.vmem [#allocation2], %s351_s7  ;;  %s167_s18 = sshll.u32 %s166_s22, 4  ;;  %s168_s18 = int_to_ptr.hbm [resolvable:$true] %s167_s18 }
  0x1b   : > { %s169_s25 = sshll.u32 %s159_s23, 4  ;;  %p378_p2 = pnand %p386_p7, %p686_p3  ;;  %s170_s25 = int_to_ptr.vmem [resolvable:$true] %s169_s25 }
  0x1c   : > { %s156_s26 = scalar_lea.sflag [#allocation3], %s155_s6  ;;  %181 = sbr.rel (%p667_p8) target bundleno = 52 (0x34), region = 28 }
  0x1d   : > { %380 = dma.hbm_to_vmem [thread:$0]  (!%p378_p2), %s168_s18, 256, %s170_s25, %s156_s26, %s591_s27, %s591_s27, %s592_s28  }
  0x1e   : > { %s715_s30 = sand.u32 (!%p667_p8), 1, %s572_s10  }
  0x1f   : > { %s355_s5 = sshll.u32 (!%p667_p8), %s715_s30, 4  ;;  %s184_s7 = scalar_lea.sflag (!%p667_p8), [#allocation3], %s715_s30 }
  0x20   : > { %s187_s15 = scalar_lea.vmem (!%p667_p8), [#allocation2], %s355_s5 }
  0x21   : > { %555 = dma.done.wait (%p654_p4), %s184_s7, 256  }
  0x22   : > { %557 = vsyncadd (%p654_p4), %s184_s7, 4294967040 }
  0x23   : > { %559 = dma.done.wait (%p644_p1), [#allocation6], 256  }
  0x24   : > { %561 = vsyncadd (%p644_p1), [#allocation6], 4294967040  ;;  %s364_s24 = sshll.u32 %s580_s12, 4  ;;  %s213_s6 = scalar_lea.vmem [#allocation7], %s355_s5  ;;  %v221_v0 = vld [vmem:[%s187_s15] sm:$0xff]  ;;  %v222_v2 = vld [vmem:[%s187_s15 + $0x8] sm:$0xff] }
  0x25   : > { %s243_s3 = scalar_lea.hbm %s767_s2, %s364_s24  ;;  %s244_s16 = sshll.u32 %s213_s6, 4  ;;  %v223_v1 = vld [vmem:[#allocation5] sm:$0xff]  ;;  %v224_v4 = vld [vmem:[#allocation5 + $0x8] sm:$0xff]  ;;  %s245_s16 = int_to_ptr.vmem [resolvable:$true] %s244_s16 }
  0x26   : > { %s246_s21 = sshll.u32 %s243_s3, 4  ;;  %v225_v3 = vadd.f32 %v223_v1, %v221_v0  ;;  %v226_v5 = vadd.f32 %v224_v4, %v222_v2  ;;  %s230_s17 = scalar_lea.sflag [#allocation4], %s715_s30  ;;  %s247_s21 = int_to_ptr.hbm [resolvable:$true] %s246_s21 }
  0x27   : > { %s516_s12 = sshra.s32 %s247_s21, 4  ;;  %s522_s25 = scalar_lea.hbm %s767_s2, 32  ;;  %s517_s12 = int_to_ptr.hbm [resolvable:$true] %s516_s12 }
  0x28   : > { %227 = vst [vmem:[%s213_s6] sm:$0xff] %v225_v3  ;;  %s518_s19 = scalar_lea.hbm %s517_s12, 16  ;;  %p523_p10 = scmp.lt.s32.totalorder %s517_s12, %s767_s2 }
  0x29   : > { %228 = vst [vmem:[%s213_s6 + $0x8] sm:$0xff] %v226_v5  ;;  %p519_p1 = scmp.ne.s32.totalorder %s517_s12, %s518_s19  ;;  %p524_p12 = scmp.lt.s32.totalorder %s522_s25, %s518_s19 }
  0x2b   : > { %p520_p4 = pnand %p519_p1, %p692_p5  ;;  %p525_p13 = por %p524_p12, %p523_p10 }
  0x2d   : > { %p521_p8 = pneg %p520_p4 }
  0x2f   : > { %p526_p0 = pnand %p525_p13, %p521_p8 }
  0x31   : > { %529 = shalt.err (!%p526_p0)
}
  0x32   : > { %s593_s30 = smov 128   ;;  %s594_s5 = smov 8  }
  0x33   : > { %371 = dma.vmem_to_hbm [thread:$0]  (%p692_p5), %s245_s16, 256, %s247_s21, %s230_s17, %s593_s30, %s593_s30, %s594_s5  }
  0x34 PF: > { %s261_s7 = sand.u32 1, %s568_s9   ;;  %p382_p3 = pnand %p350_p11, %p659_p6 }
  0x35   : > { %s262_s15 = scalar_lea.sflag [#allocation4], %s261_s7 }
  0x36   : > { %p383_p7 = pneg %p382_p3 }
  0x38   : > { %563 = dma.done.wait (%p383_p7), %s262_s15, 256  }
  0x39   : > { %565 = vsyncadd (%p383_p7), %s262_s15, 4294967040  ;;  %s19_s14 = sadd.s32 1, %s588_s14   ;;  %s775_s9 = smov %s572_s10 }
  0x3a   : > { %p16_p9 = scmp.ge.s32.totalorder %s19_s14, 4   ;;  %s776_s10 = smov %s576_s11 }
  0x3b   : > { %s777_s11 = smov %s701_s8  ;;  %s778_s12 = smov %s584_s13 }
  0x3c   : > { %s779_s13 = smov %s781_s29  ;;  %18 = sbr.rel (!%p16_p9) target bundleno = 7 (0x7), region = 78 }
  0x41   :  { %268 = vsyncpa [#allocation3], 1 }
  0x42   :  { %270 = vsyncpa [#allocation3 + $0x1], 1 }
  0x43   :  { %271 = vsyncpa [#allocation6], 1 }
  0x44   :  { %272 = vsyncpa [#allocation4], 1 }
  0x45   :  { %274 = vsyncpa [#allocation4 + $0x1], 1 }

</bundles_post_ra>
